<compile_context>
chip_gen: v5e
topology: v5e:2x2
jax: 0.10.0
libtpu: 0.0.40
codegen_flags: <defaults>
</compile_context>

<pallas_src>
import jax
import jax.numpy as jnp
from jax import lax
from jax.experimental import pallas as pl
from jax.experimental.pallas import tpu as pltpu


def _round_up(n, m):
    return ((n + m - 1) // m) * m


def crpp_kernel(k_ref, x_ref, w_ref, ba_ref, o_ref):
    # k_ref : (1, 1)  f32 scalar-prefetch ref in SMEM  (spectral radius scale)
    # x_ref : (TILE_B, D_pad)  input block
    # w_ref : (D_pad, D_pad)   spectral-normalized weight, (out, in) layout
    # ba_ref: (2, D_pad)       row 0 = bias, row 1 = a (coff gate pre-activation)
    x = x_ref[...].astype(jnp.float32)                       # no-op when x is f32
    h = jnp.maximum(x, 0.0)                                  # ReLU

    # h @ W.T without transposing W in the wrapper: contract axis 1 of both operands.
    lin = lax.dot_general(
        h, w_ref[...].astype(jnp.float32),
        dimension_numbers=(((1,), (1,)), ((), ())),
        preferred_element_type=jnp.float32)                  # MXU, f32 accumulate

    ba = ba_ref[...].astype(jnp.float32)                     # (2, D_pad)
    bias = ba[0:1, :]                                        # (1, D_pad)
    a = ba[1:2, :]                                           # (1, D_pad)

    y = k_ref[0, 0] * (lin + bias) + x                       # scaled_spectral + residual
    gate = jax.nn.sigmoid(a)                                 # EUP sigmoid, f32
    o_ref[...] = (gate * y).astype(o_ref.dtype)              # single cast at store


def crpp_forward(x, w_sn, bias, k, a, *, tile_b=512):
    """x: (B, D); w_sn: (D, D) spectral-normalized Linear weight (out, in);
    bias: (D,); k: (1, 1); a: (1, D).  Returns sigmoid(a) * (k*(ReLU(x)@W.T + b) + x)."""
    B, D = x.shape
    D_pad = _round_up(D, 128)                 # lane-dense last dim
    tile_b = min(tile_b, _round_up(B, 8))     # sublane-aligned batch tile
    B_pad = _round_up(B, tile_b)

    # Zero padding keeps semantics exact: padded lanes of h, W, bias are 0, so the
    # padded region of the (gated) output is 0 and is sliced away below.
    x_p = x
    if (B_pad, D_pad) != (B, D):
        x_p = jnp.zeros((B_pad, D_pad), x.dtype).at[:B, :D].set(x)
    w_p = w_sn
    if D_pad != D:
        w_p = jnp.zeros((D_pad, D_pad), w_sn.dtype).at[:D, :D].set(w_sn)
    ba = jnp.zeros((2, D_pad), jnp.float32)
    ba = ba.at[0, :D].set(bias.reshape(-1).astype(jnp.float32))
    ba = ba.at[1, :D].set(a.reshape(-1).astype(jnp.float32))
    k2 = jnp.asarray(k, jnp.float32).reshape(1, 1)

    grid = (B_pad // tile_b,)
    out = pl.pallas_call(
        crpp_kernel,
        out_shape=jax.ShapeDtypeStruct((B_pad, D_pad), x.dtype),
        grid_spec=pltpu.PrefetchScalarGridSpec(
            num_scalar_prefetch=1,                       # k -> SMEM, no VMEM tile/DMA
            grid=grid,
            in_specs=[
                pl.BlockSpec((tile_b, D_pad), lambda i, k_s: (i, 0)),   # x (streamed)
                pl.BlockSpec((D_pad, D_pad), lambda i, k_s: (0, 0)),    # W (resident)
                pl.BlockSpec((2, D_pad),     lambda i, k_s: (0, 0)),    # [bias; a]
            ],
            out_specs=pl.BlockSpec((tile_b, D_pad), lambda i, k_s: (i, 0)),
        ),
        compiler_params=pltpu.CompilerParams(
            dimension_semantics=("parallel",),           # shard batch tiles across TCs
        ),
    )(k2, x_p, w_p, ba)
    return out[:B, :D]


def reference_forward(x, w_sn, bias, k, a):
    h = jnp.maximum(x, 0.0)
    lin = h @ w_sn.T + bias
    y = k * lin + x
    return jax.nn.sigmoid(a) * y


if __name__ == "__main__":
    # Config 1: module-sized problem (input_size = output_size = 32), exercises D padding.
    key = jax.random.PRNGKey(0)
    B, D = 8, 32
    kx, kw, kb, ka = jax.random.split(key, 4)

    x = jax.random.normal(kx, (B, D), dtype=jnp.float32)
    w_raw = jax.random.normal(kw, (D, D), dtype=jnp.float32) * 0.1
    sigma = jnp.linalg.svd(w_raw, compute_uv=False)[0]
    w_sn = w_raw / sigma                                   # spectral-normalized weight
    bias = jax.random.normal(kb, (D,), dtype=jnp.float32) * 0.01
    k = jnp.full((1, 1), 1.0, dtype=jnp.float32)           # k.data.fill_(1)
    a = jnp.full((1, D), 0.0, dtype=jnp.float32)           # coff fill_val=0 -> sigmoid(0)=0.5
    # TODO(synk): nn.Dropout is identity in eval mode; training-time dropout not modeled.

    out = crpp_forward(x, w_sn, bias, k, a)
    jax.block_until_ready(out)
    ref = reference_forward(x, w_sn, bias, k, a)
    assert jnp.allclose(out, ref, atol=1e-5, rtol=1e-5), "mismatch vs reference (cfg 1)"

    # Config 2: lane-exact D=128 with a multi-step batch grid (tile_b=16 -> grid=(3,)).
    key2 = jax.random.PRNGKey(1)
    B2, D2 = 48, 128
    kx2, kw2, kb2, ka2 = jax.random.split(key2, 4)
    x2 = jax.random.normal(kx2, (B2, D2), dtype=jnp.float32)
    w2 = jax.random.normal(kw2, (D2, D2), dtype=jnp.float32) * 0.05
    w2 = w2 / jnp.linalg.svd(w2, compute_uv=False)[0]
    b2 = jax.random.normal(kb2, (D2,), dtype=jnp.float32) * 0.01
    k2 = jnp.full((1, 1), 0.7, dtype=jnp.float32)
    a2 = jax.random.normal(ka2, (1, D2), dtype=jnp.float32)

    out2 = crpp_forward(x2, w2, b2, k2, a2, tile_b=16)
    jax.block_until_ready(out2)
    ref2 = reference_forward(x2, w2, b2, k2, a2)
    assert jnp.allclose(out2, ref2, atol=1e-5, rtol=1e-5), "mismatch vs reference (cfg 2)"

    print("KERNEL_OK")
</pallas_src>

<mosaic_0001>
module attributes {stable_mosaic.version = 11 : i64} {
  func.func @crpp_kernel(%arg0: i32, %arg1: memref<1x1xf32, #tpu.memory_space<smem>>, %arg2: memref<8x128xf32, #tpu.memory_space<vmem>>, %arg3: memref<128x128xf32, #tpu.memory_space<vmem>>, %arg4: memref<2x128xf32, #tpu.memory_space<vmem>>, %arg5: memref<8x128xf32, #tpu.memory_space<vmem>>) attributes {dimension_semantics = [#tpu.dimension_semantics<parallel>], iteration_bounds = array<i64: 1>, scalar_prefetch = 1 : i64, scratch_operands = 0 : i64, tpu.core_type = #tpu.core_type<tc>, window_params = [{transform_indices = @transform_0, window_bounds = array<i64: 8, 128>}, {pipeline_mode = #tpu.pipeline_mode<synchronous>, transform_indices = @transform_1, window_bounds = array<i64: 128, 128>}, {pipeline_mode = #tpu.pipeline_mode<synchronous>, transform_indices = @transform_2, window_bounds = array<i64: 2, 128>}, {transform_indices = @transform_3, window_bounds = array<i64: 8, 128>}]} {
    %c0 = arith.constant 0 : index
    %c0_0 = arith.constant 0 : index
    %0 = vector.load %arg2[%c0, %c0_0] : memref<8x128xf32, #tpu.memory_space<vmem>>, vector<8x128xf32>
    %cst = arith.constant 0.000000e+00 : f32
    %1 = vector.broadcast %cst : f32 to vector<8x128xf32>
    %2 = arith.maximumf %0, %1 : vector<8x128xf32>
    %c0_1 = arith.constant 0 : index
    %c0_2 = arith.constant 0 : index
    %3 = vector.load %arg3[%c0_1, %c0_2] : memref<128x128xf32, #tpu.memory_space<vmem>>, vector<128x128xf32>
    %cst_3 = arith.constant dense<0.000000e+00> : vector<8x128xf32>
    %4 = tpu.matmul %2, %3, %cst_3 {dimension_numbers = #tpu.dot_dimension_numbers<[1], [1], [0], [0], [0, 0, 1, 0], [], []>} : vector<8x128xf32>, vector<128x128xf32>, vector<8x128xf32> -> vector<8x128xf32>
    %c0_4 = arith.constant 0 : index
    %c0_5 = arith.constant 0 : index
    %5 = vector.load %arg4[%c0_4, %c0_5] : memref<2x128xf32, #tpu.memory_space<vmem>>, vector<2x128xf32>
    %6 = vector.extract_strided_slice %5 {offsets = [0, 0], sizes = [1, 128], strides = [1, 1]} : vector<2x128xf32> to vector<1x128xf32>
    %7 = vector.extract_strided_slice %5 {offsets = [1, 0], sizes = [1, 128], strides = [1, 1]} : vector<2x128xf32> to vector<1x128xf32>
    %c0_6 = arith.constant 0 : index
    %c0_7 = arith.constant 0 : index
    %8 = memref.load %arg1[%c0_6, %c0_7] : memref<1x1xf32, #tpu.memory_space<smem>>
    %9 = vector.broadcast %6 : vector<1x128xf32> to vector<8x128xf32>
    %10 = arith.addf %4, %9 : vector<8x128xf32>
    %11 = vector.broadcast %8 : f32 to vector<8x128xf32>
    %12 = arith.mulf %11, %10 : vector<8x128xf32>
    %13 = arith.addf %12, %0 : vector<8x128xf32>
    %14 = arith.negf %7 : vector<1x128xf32>
    %15 = math.exp %14 : vector<1x128xf32>
    %cst_8 = arith.constant 1.000000e+00 : f32
    %16 = vector.broadcast %cst_8 : f32 to vector<1x128xf32>
    %17 = arith.addf %16, %15 : vector<1x128xf32>
    %18 = arith.divf %16, %17 : vector<1x128xf32>
    %19 = vector.broadcast %18 : vector<1x128xf32> to vector<8x128xf32>
    %20 = arith.mulf %19, %13 : vector<8x128xf32>
    %c0_9 = arith.constant 0 : index
    %c0_10 = arith.constant 0 : index
    %21 = vector.load %arg5[%c0_9, %c0_10] : memref<8x128xf32, #tpu.memory_space<vmem>>, vector<8x128xf32>
    tpu.vector_store %arg5[%c0_9, %c0_10], %20 {strides = array<i32>} : memref<8x128xf32, #tpu.memory_space<vmem>>, vector<8x128xf32>,
    return
  }
  func.func @transform_0(%arg0: i32, %arg1: memref<1x1xf32, #tpu.memory_space<smem>>) -> (i32, i32) {
    %c0_i32 = arith.constant 0 : i32
    %c0_i32_0 = arith.constant 0 : i32
    return %arg0, %c0_i32 : i32, i32
  }
  func.func @transform_1(%arg0: i32, %arg1: memref<1x1xf32, #tpu.memory_space<smem>>) -> (i32, i32) {
    %c0_i32 = arith.constant 0 : i32
    %c0_i32_0 = arith.constant 0 : i32
    %c0_i32_1 = arith.constant 0 : i32
    return %c0_i32, %c0_i32_0 : i32, i32
  }
  func.func @transform_2(%arg0: i32, %arg1: memref<1x1xf32, #tpu.memory_space<smem>>) -> (i32, i32) {
    %c0_i32 = arith.constant 0 : i32
    %c0_i32_0 = arith.constant 0 : i32
    %c0_i32_1 = arith.constant 0 : i32
    return %c0_i32, %c0_i32_0 : i32, i32
  }
  func.func @transform_3(%arg0: i32, %arg1: memref<1x1xf32, #tpu.memory_space<smem>>) -> (i32, i32) {
    %c0_i32 = arith.constant 0 : i32
    %c0_i32_0 = arith.constant 0 : i32
    return %arg0, %c0_i32 : i32, i32
  }
}

</mosaic_0001>

<bundles_post_ra>
// kernel: tpu_custom_call.1
= control target key start
LH: loop header
LB: loop body
LE: loop exit
PB: predicated region body
PF: predicated region fallthrough
CT: control target
= control target key end

     0   :  { %10 = vsyncpa [#allocation5], 0  ;;  %s264_s0 = inlined_call_operand.<no memory space> [shape: f32[1,1], index: 0, kind: input, shape index: {}]   ;;  %s265_s1 = inlined_call_operand.hbm [shape: f32[8,128], index: 1, kind: input, shape index: {}]   ;;  %s266_s2 = inlined_call_operand.hbm [shape: f32[128,128], index: 2, kind: input, shape index: {}]   ;;  %s267_s3 = inlined_call_operand.vmem [shape: f32[2,128], index: 3, kind: input, shape index: {}]   ;;  %s268_s4 = inlined_call_operand.hbm [shape: f32[8,128], index: 4, kind: output, shape index: {}]  }
   0x1   :  { %11 = vsyncpa [#allocation8], 0 }
   0x2   :  { %12 = vsyncpa [#allocation6], 0  ;;  %s18_s17 = sshll.u32 %s265_s1, 4  ;;  %s219_s18 = smov [#allocation4]   ;;  %s19_s17 = int_to_ptr.hbm [resolvable:$true] %s18_s17 }
   0x3   :  { %s20_s19 = sshll.u32 %s219_s18, 4  ;;  %s28_s22 = sshll.u32 %s266_s2, 4  ;;  %s21_s19 = int_to_ptr.vmem [resolvable:$true] %s20_s19  ;;  %s29_s22 = int_to_ptr.hbm [resolvable:$true] %s28_s22 }
   0x4   :  { %23 = dma.hbm_to_vmem [thread:$0]  %s19_s17, 128, %s21_s19, [#allocation5]  }
   0x5   :  { %s220_s23 = smov [#allocation7]   ;;  %s221_s25 = smov 128  }
   0x6   :  { %s30_s24 = sshll.u32 %s220_s23, 4  ;;  %s222_s26 = smov 8   ;;  %s31_s24 = int_to_ptr.vmem [resolvable:$true] %s30_s24 }
   0x7   :  { %36 = dma.hbm_to_vmem [thread:$0]  %s29_s22, 2048, %s31_s24, [#allocation8], %s221_s25, %s221_s25, %s222_s26  }
   0x8   :  { %213 = dma.done.wait [#allocation5], 128  }
   0x9   :  { %214 = vsyncadd [#allocation5], 4294967168 }
   0xa   :  { %215 = dma.done.wait [#allocation8], 2048  }
   0xb   :  { %216 = vsyncadd [#allocation8], 4294965248  ;;  %v64_v0 = vld [vmem:[#allocation7 + $0x78] sm:$0xff]  ;;  %v63_v1 = vld [vmem:[#allocation7 + $0x70] sm:$0xff]  ;;  %v88_v33 = vstv %s264_s0  ;;  %s223_s28 = smov [#allocation9]   ;;  %s120_s6 = sshll.u32 %s268_s4, 4  ;;  %s121_s6 = int_to_ptr.hbm [resolvable:$true] %s120_s6 }
   0xc   :  { %68 = vmatpush.xpose.msra.mxu0 %v64_v0  ;;  %v62_v2 = vld [vmem:[#allocation7 + $0x68] sm:$0xff]  ;;  %v61_v3 = vld [vmem:[#allocation7 + $0x60] sm:$0xff]  ;;  %v60_v4 = vld [vmem:[#allocation7 + $0x58] sm:$0xff]  ;;  %s118_s29 = sshll.u32 %s223_s28, 4  ;;  %s119_s29 = int_to_ptr.vmem [resolvable:$true] %s118_s29 }
   0xd   :  { %v59_v5 = vld [vmem:[#allocation7 + $0x50] sm:$0xff]  ;;  %v58_v6 = vld [vmem:[#allocation7 + $0x48] sm:$0xff]  ;;  %v57_v7 = vld [vmem:[#allocation7 + $0x40] sm:$0xff] }
   0xe   :  { %v56_v8 = vld [vmem:[#allocation7 + $0x38] sm:$0xff]  ;;  %v55_v9 = vld [vmem:[#allocation7 + $0x30] sm:$0xff]  ;;  %v54_v10 = vld [vmem:[#allocation7 + $0x28] sm:$0xff] }
   0xf   :  { %v53_v11 = vld [vmem:[#allocation7 + $0x20] sm:$0xff]  ;;  %v52_v12 = vld [vmem:[#allocation7 + $0x18] sm:$0xff]  ;;  %v51_v13 = vld [vmem:[#allocation7 + $0x10] sm:$0xff] }
  0x10   :  { %69 = vmatpush.xpose.msra.mxu0 %v63_v1  ;;  %v50_v14 = vld [vmem:[#allocation7 + $0x8] sm:$0xff]  ;;  %v47_v15 = vld [vmem:[#allocation4] sm:$0xff]  ;;  %v49_v16 = vld [vmem:[#allocation7] sm:$0xff] }
  0x11   :  { %v48_v17 = vmax.f32 %v47_v15, 0.0  ;;  %v65_v18 = vld [vmem:[%s267_s3] sm:$0x3] }
  0x12   :  { %v131_v19 = vmul.f32 -1.442695, %v65_v18  ;;  %v67_v30 = vperm.slane %v65_v18, 0 }
  0x14   :  { %70 = vmatpush.xpose.msra.mxu0 %v62_v2  ;;  %137 = vpow2.f32 %v131_v19 }
  0x18   :  { %71 = vmatpush.xpose.msra.mxu0 %v61_v3 }
  0x1a   :  { %v138_v20 = vpop.eup %137 }
  0x1b   :  { %v94_v21 = vadd.f32 1.0, %v138_v20 }
  0x1c   :  { %72 = vmatpush.xpose.msra.mxu0 %v60_v4 }
  0x1d   :  { %139 = vrcp.f32 %v94_v21  ;;  %vm100_vm0 = vweird.f32 %v94_v21  ;;  %v106_v26 = vand.u32 2147483648, %v94_v21  ;;  %v104_v28 = vand.u32 2147483647, %v94_v21 }
  0x1f   :  { %v107_v29 = vor.u32 1.1754944e-38, %v106_v26  ;;  %vm105_vm3 = vcmp.eq.f32.partialorder %v104_v28, 8.507059e+37 }
  0x20   :  { %73 = vmatpush.xpose.msra.mxu0 %v59_v5 }
  0x23   :  { %v140_v22 = vpop.eup %139 }
  0x24   :  { %74 = vmatpush.xpose.msra.mxu0 %v58_v6  ;;  %v96_v23 = vmul.f32 %v140_v22, %v94_v21  ;;  %vm101_vm1 = vweird.f32 %v140_v22 }
  0x25   :  { %vm102_vm2 = vmor %vm100_vm0, %vm101_vm1 }
  0x26   :  { %v97_v24 = vsub.f32 1.0, %v96_v23 }
  0x28   :  { %75 = vmatpush.xpose.msra.mxu0 %v57_v7  ;;  %v98_v25 = vmul.f32 %v140_v22, %v97_v24 }
  0x2a   :  { %v99_v27 = vadd.f32 %v140_v22, %v98_v25 }
  0x2c   :  { %76 = vmatpush.xpose.msra.mxu0 %v56_v8  ;;  %v103_v31 = vsel %vm102_vm2, %v140_v22, %v99_v27 }
  0x2d   :  { %v108_v34 = vsel %vm105_vm3, %v107_v29, %v103_v31 }
  0x2e   :  { %v110_v37 = vperm.slane %v108_v34, 1 }
  0x30   :  { %77 = vmatpush.xpose.msra.mxu0 %v55_v9 }
  0x34   :  { %78 = vmatpush.xpose.msra.mxu0 %v54_v10 }
  0x38   :  { %79 = vmatpush.xpose.msra.mxu0 %v53_v11 }
  0x3c   :  { %80 = vmatpush.xpose.msra.mxu0 %v52_v12 }
  0x40   :  { %81 = vmatpush.xpose.msra.mxu0 %v51_v13 }
  0x44   :  { %82 = vmatpush.xpose.msra.mxu0 %v50_v14 }
  0x48   :  { %83 = vmatpush.xpose.msra.mxu0 %v49_v16 }
  0x4b   :  { %84 = vmatmul.f32.vlgmr.msra.gmra.mxu0 %v48_v17 }
  0xc8   :  { %v85_v32 = vpop.f32.mrf.mxu0 }
  0xc9   :  { %v86_v35 = vadd.f32 %v85_v32, %v67_v30 }
  0xcb   :  { %v89_v36 = vmul.f32 %v88_v33, %v86_v35 }
  0xcd   :  { %v90_v38 = vadd.f32 %v89_v36, %v47_v15 }
  0xcf   :  { %v111_v39 = vmul.f32 %v110_v37, %v90_v38 }
  0xd1   :  { %112 = vst [vmem:[#allocation9] sm:$0xff] %v111_v39 }
  0xd2   :  { %123 = dma.vmem_to_hbm [thread:$0]  %s119_s29, 128, %s121_s6, [#allocation6]  }
  0xd3   :  { %217 = dma.done.wait [#allocation6], 128  }
  0xd4   :  { %218 = vsyncadd [#allocation6], 4294967168 }
  0xd5   :  { %128 = vsyncpa [#allocation5], 1 }
  0xd6   :  { %129 = vsyncpa [#allocation8], 1 }
  0xd7   :  { %130 = vsyncpa [#allocation6], 1 }

</bundles_post_ra>
